<compile_context>
chip_gen: v5e
topology: v5e:2x2
jax: 0.10.0
libtpu: 0.0.40
codegen_flags: <defaults>
</compile_context>

<pallas_src>
import jax
import jax.numpy as jnp
from jax.experimental import pallas as pl
from jax.experimental.pallas import tpu as pltpu


def _round_up(x: int, m: int) -> int:
    return ((x + m - 1) // m) * m


def _choose_tk(H: int, cdt_bytes: int,
               max_w1_block_bytes: int = 8 * 1024 * 1024) -> int:
    """Contraction tile for fc1.  tk must be a multiple of 128 that divides H
    (so the x-tile lane constraint holds and no partial K block can pollute
    the accumulation), or H itself when the whole W1 fits the per-buffer
    budget."""
    if H * H * cdt_bytes <= max_w1_block_bytes:
        return H
    tk = (max_w1_block_bytes // (H * cdt_bytes)) // 128 * 128
    while tk >= 128:
        if H % tk == 0:
            return tk
        tk -= 128
    # TODO(synk): H has no 128-multiple divisor; fall back to an unsplit K
    # (may exceed the per-buffer budget for pathological H).
    return H


def _gate_kernel(x_ref, w1_ref, b1_ref, w2_ref, b2_ref, o_ref, acc_ref):
    k = pl.program_id(1)

    @pl.when(k == 0)
    def _init():
        acc_ref[...] = jnp.zeros_like(acc_ref)

    # Cast the streamed activation tile in-kernel (VPU, hidden under the MXU)
    # instead of a separate wrapper-side XLA cast pass over x in HBM.
    x_blk = x_ref[...].astype(w1_ref.dtype)
    acc_ref[...] += jnp.dot(x_blk, w1_ref[...],
                            preferred_element_type=jnp.float32)

    @pl.when(k == pl.num_programs(1) - 1)
    def _finalize():
        # Bias + relu in f32 on the VPU (v5e has no bf16 VPU path; free here).
        h = jnp.maximum(acc_ref[...] + b1_ref[...], 0.0)
        y = jnp.dot(h.astype(w2_ref.dtype), w2_ref[...],
                    preferred_element_type=jnp.float32)
        o_ref[...] = (y + b2_ref[...]).astype(o_ref.dtype)


def prepare_gate_params(w1, b1, w2, b2, *, compute_dtype=jnp.bfloat16,
                        lane_pad=128):
    """One-time (load-time) parameter prep -- hoisted out of the hot path.

    w1: [H, H] torch layout (out, in); b1: [H]; w2: [E, H]; b2: [E].
    compute_dtype: MXU operand dtype for the weights (default bf16: the gate
    is W1-HBM-bound for B << H, so halving weight bytes ~halves wall time;
    pass jnp.float32 for bit-exact f32 semantics).  Accumulation, bias and
    relu are always f32.
    """
    H = w1.shape[1]
    E = w2.shape[0]
    cdt = jnp.dtype(compute_dtype) if compute_dtype is not None else w1.dtype
    E_pad = _round_up(max(E, lane_pad), lane_pad)

    w1_t = jnp.transpose(w1).astype(cdt)                        # [H, H]
    b1_2d = b1.reshape(1, H).astype(jnp.float32)                # [1, H]   f32
    w2_pad = jnp.pad(w2.astype(cdt), ((0, E_pad - E), (0, 0)))  # [E_pad, H]
    w2_t = jnp.transpose(w2_pad)                                # [H, E_pad]
    b2_2d = jnp.pad(b2.astype(jnp.float32).reshape(1, E),
                    ((0, 0), (0, E_pad - E)))                   # [1, E_pad] f32
    return dict(w1_t=w1_t, b1=b1_2d, w2_t=w2_t, b2=b2_2d,
                H=H, E=E, E_pad=E_pad, compute_dtype=cdt)


def depth_2_gate_apply(x, params, *, block_rows=256):
    """x: [B, H] -> [B, E]. Per-call path: pallas_call + slice only."""
    B, H = x.shape
    assert H == params["H"], "hidden size mismatch"
    E, E_pad = params["E"], params["E_pad"]
    cdt = params["compute_dtype"]
    cdt_bytes = jnp.dtype(cdt).itemsize
    out_dtype = x.dtype
    x_bytes = jnp.dtype(x.dtype).itemsize
    out_bytes = jnp.dtype(out_dtype).itemsize

    # Row tiling: 16-row alignment for bf16 sublane packing (8 for f32 /
    # tiny B), snapped to 256 for large batches to fill the 256-wide MXU on
    # v6e/v7x.  No wrapper-side pad: grid = cdiv(B, tm); the last partial row
    # block reads unspecified rows, which is safe only because rows are
    # independent and the clipped output write / [:, :E] slice drop them.
    align = 16 if (cdt_bytes == 2 and B >= 16) else 8
    tm = _round_up(min(block_rows, _round_up(B, align)), align)
    if B >= 256:
        tm = _round_up(tm, 256)
    n_tiles = pl.cdiv(B, tm)

    # K tiling of the fc1 contraction (innermost grid axis, "arbitrary").
    tk = _choose_tk(H, cdt_bytes)
    n_k = H // tk

    # Constant-index (resident) blocks: fetched once, single-buffered.
    resident = pl.Buffered(1)
    w1_bufs = 1 if n_k == 1 else 2   # stream W1 (double-buffer) only if K-split

    in_specs = [
        pl.BlockSpec((tm, tk), lambda i, k: (i, k)),                 # x stream
        pl.BlockSpec((tk, H), lambda i, k: (k, 0),
                     pipeline_mode=pl.Buffered(w1_bufs)),            # W1
        pl.BlockSpec((1, H), lambda i, k: (0, 0),
                     pipeline_mode=resident),                        # b1
        pl.BlockSpec((H, E_pad), lambda i, k: (0, 0),
                     pipeline_mode=resident),                        # W2
        pl.BlockSpec((1, E_pad), lambda i, k: (0, 0),
                     pipeline_mode=resident),                        # b2
    ]
    out_specs = pl.BlockSpec((tm, E_pad), lambda i, k: (i, 0))

    # Per-TC VMEM accounting (each TC holds its own copy of the weights).
    vmem_need = (
        w1_bufs * tk * H * cdt_bytes        # W1 slab(s)
        + H * E_pad * cdt_bytes             # W2 (resident, single buffer)
        + H * 4 + E_pad * 4                 # biases (f32, single buffer)
        + 2 * tm * tk * x_bytes             # x tiles (double buffered)
        + 2 * tm * E_pad * out_bytes        # out tiles (double buffered)
        + tm * H * 4                        # f32 accumulator scratch
    )
    vmem_limit = int(min(max(int(vmem_need * 1.3) + (2 << 20), 32 << 20),
                         64 << 20))

    # Megacore-shard the row axis only when compute-bound enough that the
    # duplicated weight DMA into both TCs pays for itself.
    row_sem = "parallel" if (n_tiles >= 4 and B >= 2 * H) else "arbitrary"

    cost = pl.CostEstimate(
        flops=2 * B * H * (H + E_pad),
        transcendentals=0,
        bytes_accessed=(B * H * x_bytes + H * H * cdt_bytes
                        + H * E_pad * cdt_bytes + B * E_pad * out_bytes),
    )

    out = pl.pallas_call(
        _gate_kernel,
        out_shape=jax.ShapeDtypeStruct((B, E_pad), out_dtype),
        grid_spec=pltpu.PrefetchScalarGridSpec(
            num_scalar_prefetch=0,
            grid=(n_tiles, n_k),
            in_specs=in_specs,
            out_specs=out_specs,
            scratch_shapes=[pltpu.VMEM((tm, H), jnp.float32)],
        ),
        compiler_params=pltpu.CompilerParams(
            dimension_semantics=(row_sem, "arbitrary"),
            vmem_limit_bytes=vmem_limit,
        ),
        cost_estimate=cost,
    )(x, params["w1_t"], params["b1"], params["w2_t"], params["b2"])

    return out[:, :E]


def depth_2_gate(x, w1, b1, w2, b2, *, compute_dtype=jnp.bfloat16,
                 block_rows=256):
    """Convenience one-shot wrapper (prep + apply).  Prefer calling
    prepare_gate_params once at load time + depth_2_gate_apply per call."""
    params = prepare_gate_params(w1, b1, w2, b2, compute_dtype=compute_dtype)
    return depth_2_gate_apply(x, params, block_rows=block_rows)


if __name__ == "__main__":
    # Module config consistent with Depth_2_Gate(hidden_size, num_experts)
    batch = 8
    hidden_size = 32
    num_experts = 4
    init_lambda = 0.5

    key = jax.random.PRNGKey(0)
    kx, k1, k2 = jax.random.split(key, 3)

    # Deterministic param init mirroring init_weight():
    #   fc1.weight ~ N(0, 0.01), fc1.bias = 0
    #   fc2.weight ~ N(0, 0.01), fc2.bias = init_lambda
    x = jax.random.normal(kx, (batch, hidden_size), dtype=jnp.float32)
    w1 = 0.01 * jax.random.normal(k1, (hidden_size, hidden_size), jnp.float32)
    b1 = jnp.zeros((hidden_size,), jnp.float32)
    w2 = 0.01 * jax.random.normal(k2, (num_experts, hidden_size), jnp.float32)
    b2 = jnp.full((num_experts,), init_lambda, jnp.float32)

    # Pure-JAX reference (same semantics as the PyTorch module).
    ref = jnp.maximum(x @ w1.T + b1, 0.0) @ w2.T + b2

    # f32 path: exact-semantics check (matches PyTorch f32 forward).
    params_f32 = prepare_gate_params(w1, b1, w2, b2, compute_dtype=jnp.float32)
    out = jax.block_until_ready(depth_2_gate_apply(x, params_f32))
    assert out.shape == (batch, num_experts)
    assert jnp.allclose(out, ref, atol=1e-5, rtol=1e-5)

    # Default path: bf16 MXU operands, f32 accumulation / bias / relu.
    params_bf16 = prepare_gate_params(w1, b1, w2, b2)
    out_bf16 = jax.block_until_ready(depth_2_gate_apply(x, params_bf16))
    assert out_bf16.shape == (batch, num_experts)
    assert jnp.allclose(out_bf16.astype(jnp.float32), ref, atol=5e-2, rtol=5e-2)

    print("KERNEL_OK")
</pallas_src>

<mosaic_0001>
module attributes {stable_mosaic.version = 11 : i64} {
  func.func @_gate_kernel(%arg0: i32, %arg1: i32, %arg2: memref<8x32xf32, #tpu.memory_space<vmem>>, %arg3: memref<32x32xf32, #tpu.memory_space<vmem>>, %arg4: memref<1x32xf32, #tpu.memory_space<vmem>>, %arg5: memref<32x128xf32, #tpu.memory_space<vmem>>, %arg6: memref<1x128xf32, #tpu.memory_space<vmem>>, %arg7: memref<8x128xf32, #tpu.memory_space<vmem>>, %arg8: memref<8x32xf32, #tpu.memory_space<vmem>>) attributes {dimension_semantics = [#tpu.dimension_semantics<arbitrary>, #tpu.dimension_semantics<arbitrary>], iteration_bounds = array<i64: 1, 1>, scalar_prefetch = 0 : i64, scratch_operands = 1 : i64, tpu.core_type = #tpu.core_type<tc>, window_params = [{transform_indices = @transform_0, window_bounds = array<i64: 8, 32>}, {pipeline_mode = #tpu.pipeline_mode<synchronous>, transform_indices = @transform_1, window_bounds = array<i64: 32, 32>}, {pipeline_mode = #tpu.pipeline_mode<synchronous>, transform_indices = @transform_2, window_bounds = array<i64: 1, 32>}, {pipeline_mode = #tpu.pipeline_mode<synchronous>, transform_indices = @transform_3, window_bounds = array<i64: 32, 128>}, {pipeline_mode = #tpu.pipeline_mode<synchronous>, transform_indices = @transform_4, window_bounds = array<i64: 1, 128>}, {transform_indices = @transform_5, window_bounds = array<i64: 8, 128>}]} {
    %c0_i32 = arith.constant 0 : i32
    %0 = arith.cmpi eq, %arg1, %c0_i32 : i32
    %1 = arith.extui %0 : i1 to i32
    %c0_i32_0 = arith.constant 0 : i32
    %2 = arith.cmpi ne, %1, %c0_i32_0 : i32
    scf.if %2 {
      %cst_10 = arith.constant 0.000000e+00 : f32
      %12 = vector.broadcast %cst_10 : f32 to vector<8x32xf32>
      %c0_11 = arith.constant 0 : index
      %c0_12 = arith.constant 0 : index
      %13 = vector.load %arg8[%c0_11, %c0_12] : memref<8x32xf32, #tpu.memory_space<vmem>>, vector<8x32xf32>
      tpu.vector_store %arg8[%c0_11, %c0_12], %12 {strides = array<i32>} : memref<8x32xf32, #tpu.memory_space<vmem>>, vector<8x32xf32>,
    } else {
    }
    %c0 = arith.constant 0 : index
    %c0_1 = arith.constant 0 : index
    %3 = vector.load %arg2[%c0, %c0_1] : memref<8x32xf32, #tpu.memory_space<vmem>>, vector<8x32xf32>
    %c0_2 = arith.constant 0 : index
    %c0_3 = arith.constant 0 : index
    %4 = vector.load %arg8[%c0_2, %c0_3] : memref<8x32xf32, #tpu.memory_space<vmem>>, vector<8x32xf32>
    %c0_4 = arith.constant 0 : index
    %c0_5 = arith.constant 0 : index
    %5 = vector.load %arg3[%c0_4, %c0_5] : memref<32x32xf32, #tpu.memory_space<vmem>>, vector<32x32xf32>
    %cst = arith.constant dense<0.000000e+00> : vector<8x32xf32>
    %6 = tpu.matmul %3, %5, %cst {dimension_numbers = #tpu.dot_dimension_numbers<[1], [0], [0], [1], [0, 0, 1, 1], [], []>} : vector<8x32xf32>, vector<32x32xf32>, vector<8x32xf32> -> vector<8x32xf32>
    %7 = arith.addf %4, %6 : vector<8x32xf32>
    %c0_6 = arith.constant 0 : index
    %c0_7 = arith.constant 0 : index
    %8 = vector.load %arg8[%c0_6, %c0_7] : memref<8x32xf32, #tpu.memory_space<vmem>>, vector<8x32xf32>
    tpu.vector_store %arg8[%c0_6, %c0_7], %7 {strides = array<i32>} : memref<8x32xf32, #tpu.memory_space<vmem>>, vector<8x32xf32>,
    %c0_i32_8 = arith.constant 0 : i32
    %9 = arith.cmpi eq, %arg1, %c0_i32_8 : i32
    %10 = arith.extui %9 : i1 to i32
    %c0_i32_9 = arith.constant 0 : i32
    %11 = arith.cmpi ne, %10, %c0_i32_9 : i32
    scf.if %11 {
      %c0_10 = arith.constant 0 : index
      %c0_11 = arith.constant 0 : index
      %12 = vector.load %arg8[%c0_10, %c0_11] : memref<8x32xf32, #tpu.memory_space<vmem>>, vector<8x32xf32>
      %c0_12 = arith.constant 0 : index
      %c0_13 = arith.constant 0 : index
      %13 = vector.load %arg4[%c0_12, %c0_13] : memref<1x32xf32, #tpu.memory_space<vmem>>, vector<1x32xf32>
      %14 = vector.broadcast %13 : vector<1x32xf32> to vector<8x32xf32>
      %15 = arith.addf %12, %14 : vector<8x32xf32>
      %cst_14 = arith.constant 0.000000e+00 : f32
      %16 = vector.broadcast %cst_14 : f32 to vector<8x32xf32>
      %17 = arith.maximumf %15, %16 : vector<8x32xf32>
      %c0_15 = arith.constant 0 : index
      %c0_16 = arith.constant 0 : index
      %18 = vector.load %arg5[%c0_15, %c0_16] : memref<32x128xf32, #tpu.memory_space<vmem>>, vector<32x128xf32>
      %cst_17 = arith.constant dense<0.000000e+00> : vector<8x128xf32>
      %19 = tpu.matmul %17, %18, %cst_17 {dimension_numbers = #tpu.dot_dimension_numbers<[1], [0], [0], [1], [0, 0, 1, 1], [], []>} : vector<8x32xf32>, vector<32x128xf32>, vector<8x128xf32> -> vector<8x128xf32>
      %c0_18 = arith.constant 0 : index
      %c0_19 = arith.constant 0 : index
      %20 = vector.load %arg6[%c0_18, %c0_19] : memref<1x128xf32, #tpu.memory_space<vmem>>, vector<1x128xf32>
      %21 = vector.broadcast %20 : vector<1x128xf32> to vector<8x128xf32>
      %22 = arith.addf %19, %21 : vector<8x128xf32>
      %c0_20 = arith.constant 0 : index
      %c0_21 = arith.constant 0 : index
      %23 = vector.load %arg7[%c0_20, %c0_21] : memref<8x128xf32, #tpu.memory_space<vmem>>, vector<8x128xf32>
      tpu.vector_store %arg7[%c0_20, %c0_21], %22 {strides = array<i32>} : memref<8x128xf32, #tpu.memory_space<vmem>>, vector<8x128xf32>,
    } else {
    }
    return
  }
  func.func @transform_0(%arg0: i32, %arg1: i32) -> (i32, i32) {
    %c0_i32 = arith.constant 0 : i32
    return %arg0, %arg1 : i32, i32
  }
  func.func @transform_1(%arg0: i32, %arg1: i32) -> (i32, i32) {
    %c0_i32 = arith.constant 0 : i32
    %c0_i32_0 = arith.constant 0 : i32
    return %arg1, %c0_i32 : i32, i32
  }
  func.func @transform_2(%arg0: i32, %arg1: i32) -> (i32, i32) {
    %c0_i32 = arith.constant 0 : i32
    %c0_i32_0 = arith.constant 0 : i32
    %c0_i32_1 = arith.constant 0 : i32
    return %c0_i32, %c0_i32_0 : i32, i32
  }
  func.func @transform_3(%arg0: i32, %arg1: i32) -> (i32, i32) {
    %c0_i32 = arith.constant 0 : i32
    %c0_i32_0 = arith.constant 0 : i32
    %c0_i32_1 = arith.constant 0 : i32
    return %c0_i32, %c0_i32_0 : i32, i32
  }
  func.func @transform_4(%arg0: i32, %arg1: i32) -> (i32, i32) {
    %c0_i32 = arith.constant 0 : i32
    %c0_i32_0 = arith.constant 0 : i32
    %c0_i32_1 = arith.constant 0 : i32
    return %c0_i32, %c0_i32_0 : i32, i32
  }
  func.func @transform_5(%arg0: i32, %arg1: i32) -> (i32, i32) {
    %c0_i32 = arith.constant 0 : i32
    %c0_i32_0 = arith.constant 0 : i32
    return %arg0, %c0_i32 : i32, i32
  }
}

</mosaic_0001>

<bundles_post_ra>
// kernel: tpu_custom_call.1
= control target key start
LH: loop header
LB: loop body
LE: loop exit
PB: predicated region body
PF: predicated region fallthrough
CT: control target
= control target key end

     0   :  { %10 = vsyncpa [#allocation4], 0  ;;  %s336_s0 = inlined_call_operand.hbm [shape: f32[8,32], index: 0, kind: input, shape index: {}]   ;;  %s337_s1 = inlined_call_operand.hbm [shape: f32[32,32], index: 1, kind: input, shape index: {}]   ;;  %s338_s2 = inlined_call_operand.vmem [shape: f32[1,32], index: 2, kind: input, shape index: {}]   ;;  %s339_s3 = inlined_call_operand.hbm [shape: f32[32,128], index: 3, kind: input, shape index: {}]   ;;  %s340_s4 = inlined_call_operand.vmem [shape: f32[1,128], index: 4, kind: input, shape index: {}]   ;;  %s341_s5 = inlined_call_operand.hbm [shape: f32[8,128], index: 5, kind: output, shape index: {}]  }
   0x1   :  { %11 = vsyncpa [#allocation7], 0  ;;  %s28_s20 = sshll.u32 %s337_s1, 4  ;;  %s29_s20 = int_to_ptr.hbm [resolvable:$true] %s28_s20 }
   0x2   :  { %12 = vsyncpa [#allocation5], 0  ;;  %s277_s21 = smov [#allocation6]   ;;  %s18_s25 = sshll.u32 %s336_s0, 4  ;;  %s19_s25 = int_to_ptr.hbm [resolvable:$true] %s18_s25 }
   0x3   :  { %s30_s22 = sshll.u32 %s277_s21, 4  ;;  %s278_s26 = smov 128   ;;  %s31_s22 = int_to_ptr.vmem [resolvable:$true] %s30_s22 }
   0x4   :  { %s279_s27 = smov 8   ;;  %s280_s28 = smov [#allocation3]  }
   0x5   :  { %36 = dma.hbm_to_vmem [thread:$0]  %s29_s20, 512, %s31_s22, [#allocation7], %s278_s26, %s278_s26, %s279_s27  }
   0x6   :  { %s20_s29 = sshll.u32 %s280_s28, 4  ;;  %s43_s7 = sshll.u32 %s339_s3, 4  ;;  %s21_s29 = int_to_ptr.vmem [resolvable:$true] %s20_s29  ;;  %s44_s7 = int_to_ptr.hbm [resolvable:$true] %s43_s7 }
   0x7   :  { %23 = dma.hbm_to_vmem [thread:$0]  %s19_s25, 128, %s21_s29, [#allocation4]  }
   0x8   :  { %s281_s1 = smov [#allocation8]  }
   0x9   :  { %s45_s8 = sshll.u32 %s281_s1, 4  ;;  %s46_s8 = int_to_ptr.vmem [resolvable:$true] %s45_s8 }
   0xa   :  { %51 = dma.hbm_to_vmem [thread:$0]  %s44_s7, 512, %s46_s8, [#allocation7], %s278_s26, %s278_s26, %s279_s27  }
   0xb   :  { %271 = dma.done.wait [#allocation4], 128  }
   0xc   :  { %272 = vsyncadd [#allocation4], 4294967168 }
   0xd   :  { %273 = dma.done.wait [#allocation7], 1024  }
   0xe   :  { %274 = vsyncadd [#allocation7], 4294966272  ;;  %vm70_vm0 = vcmask 261120   ;;  %v282_v0 = vmov 0.0   ;;  %v77_v1 = vld [vmem:[#allocation6 + $0x18] sm:$0xff]  ;;  %v76_v2 = vld [vmem:[#allocation6 + $0x10] sm:$0xff] }
   0xf   :  { %71 = vst.msk [vmem:[#allocation2] sm:$0xff] %vm70_vm0, %v282_v0  ;;  %94 = vmatpush.msra.mxu0 %v77_v1  ;;  %v75_v3 = vld [vmem:[#allocation6 + $0x8] sm:$0xff]  ;;  %v74_v4 = vld [vmem:[#allocation6] sm:$0xff]  ;;  %v72_v5 = vld [vmem:[#allocation3] sm:$0xff]  ;;  %s283_s11 = smov [#allocation9]   ;;  %s153_s15 = sshll.u32 %s341_s5, 4  ;;  %s154_s15 = int_to_ptr.hbm [resolvable:$true] %s153_s15 }
  0x10   :  { %v117_v6 = vld [vmem:[#allocation8 + $0x18] sm:$0xff]  ;;  %v116_v7 = vld [vmem:[#allocation8 + $0x10] sm:$0xff]  ;;  %v115_v8 = vld [vmem:[#allocation8 + $0x8] sm:$0xff]  ;;  %s151_s12 = sshll.u32 %s283_s11, 4  ;;  %s152_s12 = int_to_ptr.vmem [resolvable:$true] %s151_s12 }
  0x11   :  { %95 = vmatpush.msra.mxu0 %v76_v2  ;;  %137 = vmatpush.msra.mxu1 %v117_v6  ;;  %v114_v9 = vld [vmem:[#allocation8] sm:$0xff]  ;;  %v173_v13 = vld [vmem:[%s338_s2] ss:$0 sm:$0xff] }
  0x12   :  { %v174_v17 = vld [vmem:[%s340_s4] ss:$0 sm:$0xff] }
  0x13   :  { %96 = vmatpush.msra.mxu0 %v75_v3  ;;  %138 = vmatpush.msra.mxu1 %v116_v7 }
  0x15   :  { %97 = vmatpush.msra.mxu0 %v74_v4  ;;  %139 = vmatpush.msra.mxu1 %v115_v8 }
  0x16   :  { %164 = vmatmul.msk.f32.vlgmr.msra.gmra.mxu0 %vm70_vm0, %v72_v5  ;;  %v73_v10 = vld [vmem:[#allocation2] sm:$0xff] }
  0x17   :  { %140 = vmatpush.msra.mxu1 %v114_v9 }
  0x93   :  { %v99_v11 = vpop.f32.mrf.mxu0 }
  0x94   :  { %v102_v12 = vadd.f32 %v99_v11, %v73_v10 }
  0x96   :  { %103 = vst.msk [vmem:[#allocation2] sm:$0xff] %vm70_vm0, %v102_v12 }
  0x9d   :  { %v107_v14 = vld [vmem:[#allocation2] sm:$0xff] }
  0x9e   :  { %v112_v15 = vadd.f32 %v173_v13, %v107_v14 }
  0xa0   :  { %v113_v16 = vmax.f32 %v112_v15, 0.0 }
  0xa2   :  { %165 = vmatmul.msk.f32.vlgmr.msra.gmra.mxu1 %vm70_vm0, %v113_v16 }
 0x11f   :  { %v142_v18 = vpop.f32.mrf.mxu1 }
 0x120   :  { %v143_v19 = vadd.f32 %v174_v17, %v142_v18 }
 0x122   :  { %145 = vst [vmem:[#allocation9] sm:$0xff] %v143_v19 }
 0x123   :  { %156 = dma.vmem_to_hbm [thread:$0]  %s152_s12, 128, %s154_s15, [#allocation5]  }
 0x124   :  { %275 = dma.done.wait [#allocation5], 128  }
 0x125   :  { %276 = vsyncadd [#allocation5], 4294967168 }
 0x126   :  { %161 = vsyncpa [#allocation4], 1 }
 0x127   :  { %162 = vsyncpa [#allocation7], 1 }
 0x128   :  { %163 = vsyncpa [#allocation5], 1 }

</bundles_post_ra>
